<compile_context>
chip_gen: v6e
topology: v6e:2x2x1
jax: 0.10.0
libtpu: 0.0.40
codegen_flags: <defaults>
</compile_context>

<pallas_src>
import functools
import numpy as np

import jax
import jax.numpy as jnp
from jax import lax
from jax.experimental import pallas as pl
from jax.experimental.pallas import tpu as pltpu

_SIGN_MASK = np.uint32(0x80000000)


def _layered_ms_kernel(order_ref,   # SMEM (T,)        int32 : cn_order        (scalar prefetch)
                       hcmp_ref,    # SMEM (M*w_r,)    int32 : flat H_compact   (scalar prefetch)
                       llr_ref,     # VMEM (N_pad, TB) f32   : channel LLRs (vars on sublanes)
                       c_out_ref,   # VMEM (N_pad, TB) f32   : hard decisions (output)
                       vn_ref,      # VMEM (N_pad, TB) f32   : working vn LLRs
                       c2v_ref,     # VMEM (M*w_r, TB) f32   : check-to-variable messages
                       done_ref,    # SMEM (1,)        int32 : early-termination flag
                       *, w_r, n_order, m_checks):
    tb = llr_ref.shape[1]

    # ---- init (first decoding iteration of this batch tile) ----
    @pl.when(pl.program_id(1) == 0)
    def _():
        vn_ref[...] = llr_ref[...]
        c2v_ref[...] = jnp.zeros_like(c2v_ref)
        done_ref[0] = 0

    def cn_body(t, carry):
        cn = order_ref[t]
        base = cn * w_r

        c2v_old = c2v_ref[pl.ds(base, w_r), :]                       # (w_r, TB)
        idxs = [hcmp_ref[base + j] for j in range(w_r)]
        # v2c = vn - old c2v, one (1, TB) row per edge
        v2c = [vn_ref[pl.ds(idxs[j], 1), :] - c2v_old[j:j + 1, :] for j in range(w_r)]

        abs_v = [jnp.abs(r) for r in v2c]
        sbit = [pltpu.bitcast(r, jnp.uint32) & _SIGN_MASK for r in v2c]

        # min1 / min2 / argmin scan + total sign (XOR of sign bits) -> O(w_r)
        min1 = abs_v[0]
        min2 = jnp.full_like(min1, jnp.inf)
        argmin = jnp.zeros(min1.shape, jnp.int32)
        tot_sbit = sbit[0]
        for j in range(1, w_r):
            a = abs_v[j]
            min2 = jnp.minimum(min2, jnp.maximum(min1, a))
            argmin = jnp.where(a < min1, jnp.int32(j), argmin)
            min1 = jnp.minimum(min1, a)
            tot_sbit = tot_sbit ^ sbit[j]

        # clamp magnitude (non-negative, so min(., 20) == clip(., -20, 20))
        min1 = jnp.minimum(min1, 20.0)
        min2 = jnp.minimum(min2, 20.0)

        new_rows = []
        for i in range(w_r):
            amp = jnp.where(argmin == i, min2, min1)                  # min over others
            excl_sign = tot_sbit ^ sbit[i]                            # sign product over others
            cv = pltpu.bitcast(pltpu.bitcast(amp, jnp.uint32) ^ excl_sign, jnp.float32)
            new_rows.append(cv)

        c2v_ref[pl.ds(base, w_r), :] = jnp.concatenate(new_rows, axis=0)
        for j in range(w_r):
            vn_ref[pl.ds(idxs[j], 1), :] = v2c[j] + new_rows[j]
        return carry

    # one decoding iteration (skipped once the syndrome check has passed)
    @pl.when(done_ref[0] == 0)
    def _():
        lax.fori_loop(0, n_order, cn_body, 0)

        # hard decision, exactly mirroring: c = -vn; c[c>0]=1; c[c<0]=0
        neg = -vn_ref[...]
        c_out_ref[...] = jnp.where(neg > 0, 1.0, jnp.where(neg < 0, 0.0, neg))

        # compact syndrome: per check, parity of the #(vn < 0) among its w_r vars
        def syn_body(cn, acc):
            base = cn * w_r
            cnt = jnp.zeros((1, tb), jnp.float32)
            for j in range(w_r):
                row = vn_ref[pl.ds(hcmp_ref[base + j], 1), :]
                cnt = cnt + jnp.where(row < 0.0, 1.0, 0.0)
            par = cnt - 2.0 * jnp.floor(cnt * 0.5)                    # exact mod 2 (small ints)
            return acc + par

        viol = lax.fori_loop(0, m_checks, syn_body, jnp.zeros((1, tb), jnp.float32))
        done_ref[0] = (jnp.sum(viol) == 0.0).astype(jnp.int32)


def layered_ms_decode(channel_llr, H_compact, cn_order, iters, *, tile_b=128):
    """channel_llr: (B, N) f32; H_compact: (M, w_r) int; cn_order: (T,) int."""
    B, N = channel_llr.shape
    M, w_r = H_compact.shape
    n_order = int(np.asarray(cn_order).shape[0])
    iters = int(iters)

    # pad batch to a lane-dense multiple of 128, vars to a multiple of 8
    b_pad = max(tile_b, -(-B // tile_b) * tile_b)
    n_pad = -(-N // 8) * 8

    llr_nb = jnp.zeros((n_pad, b_pad), jnp.float32)
    llr_nb = llr_nb.at[:N, :B].set(jnp.asarray(channel_llr, jnp.float32).T)

    kernel = functools.partial(_layered_ms_kernel,
                               w_r=int(w_r), n_order=n_order, m_checks=int(M))

    grid = (b_pad // tile_b, iters)   # (batch tiles, decoding iterations)

    out_nb = pl.pallas_call(
        kernel,
        out_shape=jax.ShapeDtypeStruct((n_pad, b_pad), jnp.float32),
        grid_spec=pltpu.PrefetchScalarGridSpec(
            num_scalar_prefetch=2,
            grid=grid,
            in_specs=[pl.BlockSpec((n_pad, tile_b), lambda b, it, order, hc: (0, b))],
            out_specs=pl.BlockSpec((n_pad, tile_b), lambda b, it, order, hc: (0, b)),
            scratch_shapes=[
                pltpu.VMEM((n_pad, tile_b), jnp.float32),        # working vn LLRs
                pltpu.VMEM((int(M) * int(w_r), tile_b), jnp.float32),  # c2v state (flat)
                pltpu.SMEM((1,), jnp.int32),                     # done flag
            ],
        ),
        compiler_params=pltpu.CompilerParams(
            dimension_semantics=("parallel", "arbitrary")),
    )(
        jnp.asarray(np.asarray(cn_order), jnp.int32),
        jnp.asarray(np.asarray(H_compact).reshape(-1), jnp.int32),
        llr_nb,
    )
    return out_nb[:N, :B].T                                       # back to (B, N)


# ---------------- pure-numpy reference (mirrors the PyTorch module) ----------------
def reference_forward(channel_llr, H, H_compact, mask, cn_order, iters):
    B, N = channel_llr.shape
    M = H.shape[0]
    w_r = H_compact.shape[1]
    c2v = np.zeros((B, M, w_r), dtype=np.float32)
    vn = channel_llr.astype(np.float32).copy()
    c = None
    for _ in range(iters):
        for cn in cn_order:
            cols = H_compact[cn]
            vn[:, cols] -= c2v[:, cn, :]
            v2c = vn[:, cols]                                    # (B, w_r)
            v2c_expand = v2c[:, mask]                            # (B, w_r, w_r-1)
            amps = np.min(np.abs(v2c_expand), axis=2)
            sign = np.prod(np.sign(v2c_expand), axis=2)
            cv = np.clip(sign * amps, -20, 20).astype(np.float32)
            c2v[:, cn, :] = cv
            vn[:, cols] = vn[:, cols] + cv
        c = -vn
        c = np.where(c > 0, 1.0, np.where(c < 0, 0.0, c)).astype(np.float32)
        succ = np.mod(c @ H.T.astype(np.float64), 2).sum(axis=1)
        if succ.sum() == 0:
            return c
    return c


if __name__ == "__main__":
    # Small row-regular parity-check matrix (each row weight w_r = 4).
    H = np.array([
        [1, 1, 1, 1, 0, 0, 0, 0],
        [0, 0, 0, 0, 1, 1, 1, 1],
        [1, 0, 1, 0, 1, 0, 1, 0],
        [0, 1, 0, 1, 0, 1, 0, 1],
    ], dtype=np.int64)
    M, N = H.shape
    w_r = int(H[0].sum())

    # H_compact, built exactly as in the module __init__
    H_compact = np.zeros((M, w_r), dtype=np.int64)
    x = 0
    for (r, cidx), item in np.ndenumerate(H):
        if item == 1:
            H_compact[r, x] = cidx
            x = (x + 1) % w_r

    # exclusion mask, built exactly as in the module __init__ (reference only)
    mask = np.zeros((w_r, w_r - 1), dtype=np.int64)
    for i in range(w_r):
        num = 0
        for j in range(w_r - 1):
            if i == j:
                num += 1
            mask[i, j] = num
            num += 1

    B = 2
    iters = 3
    cn_order = np.arange(M, dtype=np.int64)

    key = jax.random.PRNGKey(0)
    channel_llr = jax.random.normal(key, (B, N), dtype=jnp.float32) * 2.0

    c_kernel = layered_ms_decode(channel_llr, H_compact, cn_order, iters)
    c_kernel = jax.block_until_ready(c_kernel)

    c_ref = reference_forward(np.asarray(channel_llr), H, H_compact, mask, cn_order, iters)

    assert c_kernel.shape == (B, N)
    assert np.allclose(np.asarray(c_kernel), c_ref, atol=1e-6), (np.asarray(c_kernel), c_ref)
    print("KERNEL_OK")
</pallas_src>

<mosaic_0001>
module attributes {stable_mosaic.version = 11 : i64} {
  func.func @_layered_ms_kernel(%arg0: i32, %arg1: i32, %arg2: memref<4xi32, #tpu.memory_space<smem>>, %arg3: memref<16xi32, #tpu.memory_space<smem>>, %arg4: memref<8x128xf32, #tpu.memory_space<vmem>>, %arg5: memref<8x128xf32, #tpu.memory_space<vmem>>, %arg6: memref<8x128xf32, #tpu.memory_space<vmem>>, %arg7: memref<16x128xf32, #tpu.memory_space<vmem>>, %arg8: memref<1xi32, #tpu.memory_space<smem>>) attributes {dimension_semantics = [#tpu.dimension_semantics<parallel>, #tpu.dimension_semantics<arbitrary>], iteration_bounds = array<i64: 1, 3>, scalar_prefetch = 2 : i64, scratch_operands = 3 : i64, tpu.core_type = #tpu.core_type<tc>, window_params = [{transform_indices = @transform_0, window_bounds = array<i64: 8, 128>}, {transform_indices = @transform_1, window_bounds = array<i64: 8, 128>}]} {
    %c0_i32 = arith.constant 0 : i32
    %0 = arith.cmpi eq, %arg1, %c0_i32 : i32
    %1 = arith.extui %0 : i1 to i32
    %c0_i32_0 = arith.constant 0 : i32
    %2 = arith.cmpi ne, %1, %c0_i32_0 : i32
    scf.if %2 {
      %c0_3 = arith.constant 0 : index
      %c0_4 = arith.constant 0 : index
      %7 = vector.load %arg4[%c0_3, %c0_4] : memref<8x128xf32, #tpu.memory_space<vmem>>, vector<8x128xf32>
      %c0_5 = arith.constant 0 : index
      %c0_6 = arith.constant 0 : index
      %8 = vector.load %arg6[%c0_5, %c0_6] : memref<8x128xf32, #tpu.memory_space<vmem>>, vector<8x128xf32>
      tpu.vector_store %arg6[%c0_5, %c0_6], %7 {strides = array<i32>} : memref<8x128xf32, #tpu.memory_space<vmem>>, vector<8x128xf32>,
      %cst = arith.constant 0.000000e+00 : f32
      %9 = vector.broadcast %cst : f32 to vector<16x128xf32>
      %c0_7 = arith.constant 0 : index
      %c0_8 = arith.constant 0 : index
      %10 = vector.load %arg7[%c0_7, %c0_8] : memref<16x128xf32, #tpu.memory_space<vmem>>, vector<16x128xf32>
      tpu.vector_store %arg7[%c0_7, %c0_8], %9 {strides = array<i32>} : memref<16x128xf32, #tpu.memory_space<vmem>>, vector<16x128xf32>,
      %c0_i32_9 = arith.constant 0 : i32
      %c0_10 = arith.constant 0 : index
      %11 = memref.load %arg8[%c0_10] : memref<1xi32, #tpu.memory_space<smem>>
      memref.store %c0_i32_9, %arg8[%c0_10] : memref<1xi32, #tpu.memory_space<smem>>
    } else {
    }
    %c0 = arith.constant 0 : index
    %3 = memref.load %arg8[%c0] : memref<1xi32, #tpu.memory_space<smem>>
    %c0_i32_1 = arith.constant 0 : i32
    %4 = arith.cmpi eq, %3, %c0_i32_1 : i32
    %5 = arith.extui %4 : i1 to i32
    %c0_i32_2 = arith.constant 0 : i32
    %6 = arith.cmpi ne, %5, %c0_i32_2 : i32
    scf.if %6 {
      %c0_i32_3 = arith.constant 0 : i32
      %c4_i32 = arith.constant 4 : i32
      %7 = arith.addi %c0_i32_3, %c4_i32 : i32
      %c1_i32 = arith.constant 1 : i32
      scf.for %arg9 = %c0_i32_3 to %7 step %c1_i32  : i32 {
        %30 = arith.index_cast %arg9 : i32 to index
        %31 = memref.load %arg2[%30] : memref<4xi32, #tpu.memory_space<smem>>
        %c4_i32_21 = arith.constant 4 : i32
        %32 = arith.muli %31, %c4_i32_21 : i32
        %33 = arith.index_cast %32 : i32 to index
        %c0_22 = arith.constant 0 : index
        %34 = vector.load %arg7[%33, %c0_22] : memref<16x128xf32, #tpu.memory_space<vmem>>, vector<4x128xf32>
        %c0_i32_23 = arith.constant 0 : i32
        %35 = arith.addi %32, %c0_i32_23 : i32
        %36 = arith.index_cast %35 : i32 to index
        %37 = memref.load %arg3[%36] : memref<16xi32, #tpu.memory_space<smem>>
        %c1_i32_24 = arith.constant 1 : i32
        %38 = arith.addi %32, %c1_i32_24 : i32
        %39 = arith.index_cast %38 : i32 to index
        %40 = memref.load %arg3[%39] : memref<16xi32, #tpu.memory_space<smem>>
        %c2_i32 = arith.constant 2 : i32
        %41 = arith.addi %32, %c2_i32 : i32
        %42 = arith.index_cast %41 : i32 to index
        %43 = memref.load %arg3[%42] : memref<16xi32, #tpu.memory_space<smem>>
        %c3_i32 = arith.constant 3 : i32
        %44 = arith.addi %32, %c3_i32 : i32
        %45 = arith.index_cast %44 : i32 to index
        %46 = memref.load %arg3[%45] : memref<16xi32, #tpu.memory_space<smem>>
        %47 = arith.index_cast %37 : i32 to index
        %c0_25 = arith.constant 0 : index
        %48 = vector.load %arg6[%47, %c0_25] : memref<8x128xf32, #tpu.memory_space<vmem>>, vector<1x128xf32>
        %49 = vector.extract_strided_slice %34 {offsets = [0, 0], sizes = [1, 128], strides = [1, 1]} : vector<4x128xf32> to vector<1x128xf32>
        %50 = arith.subf %48, %49 : vector<1x128xf32>
        %51 = arith.index_cast %40 : i32 to index
        %c0_26 = arith.constant 0 : index
        %52 = vector.load %arg6[%51, %c0_26] : memref<8x128xf32, #tpu.memory_space<vmem>>, vector<1x128xf32>
        %53 = vector.extract_strided_slice %34 {offsets = [1, 0], sizes = [1, 128], strides = [1, 1]} : vector<4x128xf32> to vector<1x128xf32>
        %54 = arith.subf %52, %53 : vector<1x128xf32>
        %55 = arith.index_cast %43 : i32 to index
        %c0_27 = arith.constant 0 : index
        %56 = vector.load %arg6[%55, %c0_27] : memref<8x128xf32, #tpu.memory_space<vmem>>, vector<1x128xf32>
        %57 = vector.extract_strided_slice %34 {offsets = [2, 0], sizes = [1, 128], strides = [1, 1]} : vector<4x128xf32> to vector<1x128xf32>
        %58 = arith.subf %56, %57 : vector<1x128xf32>
        %59 = arith.index_cast %46 : i32 to index
        %c0_28 = arith.constant 0 : index
        %60 = vector.load %arg6[%59, %c0_28] : memref<8x128xf32, #tpu.memory_space<vmem>>, vector<1x128xf32>
        %61 = vector.extract_strided_slice %34 {offsets = [3, 0], sizes = [1, 128], strides = [1, 1]} : vector<4x128xf32> to vector<1x128xf32>
        %62 = arith.subf %60, %61 : vector<1x128xf32>
        %63 = math.absf %50 : vector<1x128xf32>
        %64 = math.absf %54 : vector<1x128xf32>
        %65 = math.absf %58 : vector<1x128xf32>
        %66 = math.absf %62 : vector<1x128xf32>
        %67 = tpu.bitcast %50 : vector<1x128xf32> -> vector<1x128xi32>
        %c-2147483648_i32 = arith.constant -2147483648 : i32
        %68 = vector.broadcast %c-2147483648_i32 : i32 to vector<1x128xi32>
        %69 = arith.andi %67, %68 : vector<1x128xi32>
        %70 = tpu.bitcast %54 : vector<1x128xf32> -> vector<1x128xi32>
        %c-2147483648_i32_29 = arith.constant -2147483648 : i32
        %71 = vector.broadcast %c-2147483648_i32_29 : i32 to vector<1x128xi32>
        %72 = arith.andi %70, %71 : vector<1x128xi32>
        %73 = tpu.bitcast %58 : vector<1x128xf32> -> vector<1x128xi32>
        %c-2147483648_i32_30 = arith.constant -2147483648 : i32
        %74 = vector.broadcast %c-2147483648_i32_30 : i32 to vector<1x128xi32>
        %75 = arith.andi %73, %74 : vector<1x128xi32>
        %76 = tpu.bitcast %62 : vector<1x128xf32> -> vector<1x128xi32>
        %c-2147483648_i32_31 = arith.constant -2147483648 : i32
        %77 = vector.broadcast %c-2147483648_i32_31 : i32 to vector<1x128xi32>
        %78 = arith.andi %76, %77 : vector<1x128xi32>
        %cst_32 = arith.constant 0x7F800000 : f32
        %79 = vector.broadcast %cst_32 : f32 to vector<1x128xf32>
        %c0_i32_33 = arith.constant 0 : i32
        %80 = vector.broadcast %c0_i32_33 : i32 to vector<1x128xi32>
        %81 = arith.maximumf %63, %64 : vector<1x128xf32>
        %82 = arith.minimumf %79, %81 : vector<1x128xf32>
        %83 = arith.cmpf olt, %64, %63 : vector<1x128xf32>
        %c1_i32_34 = arith.constant 1 : i32
        %84 = vector.broadcast %c1_i32_34 : i32 to vector<1x128xi32>
        %85 = arith.select %83, %84, %80 : vector<1x128xi1>, vector<1x128xi32>
        %86 = arith.minimumf %63, %64 : vector<1x128xf32>
        %87 = arith.xori %69, %72 : vector<1x128xi32>
        %88 = arith.maximumf %86, %65 : vector<1x128xf32>
        %89 = arith.minimumf %82, %88 : vector<1x128xf32>
        %90 = arith.cmpf olt, %65, %86 : vector<1x128xf32>
        %c2_i32_35 = arith.constant 2 : i32
        %91 = vector.broadcast %c2_i32_35 : i32 to vector<1x128xi32>
        %92 = arith.select %90, %91, %85 : vector<1x128xi1>, vector<1x128xi32>
        %93 = arith.minimumf %86, %65 : vector<1x128xf32>
        %94 = arith.xori %87, %75 : vector<1x128xi32>
        %95 = arith.maximumf %93, %66 : vector<1x128xf32>
        %96 = arith.minimumf %89, %95 : vector<1x128xf32>
        %97 = arith.cmpf olt, %66, %93 : vector<1x128xf32>
        %c3_i32_36 = arith.constant 3 : i32
        %98 = vector.broadcast %c3_i32_36 : i32 to vector<1x128xi32>
        %99 = arith.select %97, %98, %92 : vector<1x128xi1>, vector<1x128xi32>
        %100 = arith.minimumf %93, %66 : vector<1x128xf32>
        %101 = arith.xori %94, %78 : vector<1x128xi32>
        %cst_37 = arith.constant 2.000000e+01 : f32
        %102 = vector.broadcast %cst_37 : f32 to vector<1x128xf32>
        %103 = arith.minimumf %100, %102 : vector<1x128xf32>
        %cst_38 = arith.constant 2.000000e+01 : f32
        %104 = vector.broadcast %cst_38 : f32 to vector<1x128xf32>
        %105 = arith.minimumf %96, %104 : vector<1x128xf32>
        %c0_i32_39 = arith.constant 0 : i32
        %106 = vector.broadcast %c0_i32_39 : i32 to vector<1x128xi32>
        %107 = arith.cmpi eq, %99, %106 : vector<1x128xi32>
        %108 = arith.select %107, %105, %103 : vector<1x128xi1>, vector<1x128xf32>
        %109 = arith.xori %101, %69 : vector<1x128xi32>
        %110 = tpu.bitcast %108 : vector<1x128xf32> -> vector<1x128xi32>
        %111 = arith.xori %110, %109 : vector<1x128xi32>
        %112 = tpu.bitcast %111 : vector<1x128xi32> -> vector<1x128xf32>
        %c1_i32_40 = arith.constant 1 : i32
        %113 = vector.broadcast %c1_i32_40 : i32 to vector<1x128xi32>
        %114 = arith.cmpi eq, %99, %113 : vector<1x128xi32>
        %115 = arith.select %114, %105, %103 : vector<1x128xi1>, vector<1x128xf32>
        %116 = arith.xori %101, %72 : vector<1x128xi32>
        %117 = tpu.bitcast %115 : vector<1x128xf32> -> vector<1x128xi32>
        %118 = arith.xori %117, %116 : vector<1x128xi32>
        %119 = tpu.bitcast %118 : vector<1x128xi32> -> vector<1x128xf32>
        %c2_i32_41 = arith.constant 2 : i32
        %120 = vector.broadcast %c2_i32_41 : i32 to vector<1x128xi32>
        %121 = arith.cmpi eq, %99, %120 : vector<1x128xi32>
        %122 = arith.select %121, %105, %103 : vector<1x128xi1>, vector<1x128xf32>
        %123 = arith.xori %101, %75 : vector<1x128xi32>
        %124 = tpu.bitcast %122 : vector<1x128xf32> -> vector<1x128xi32>
        %125 = arith.xori %124, %123 : vector<1x128xi32>
        %126 = tpu.bitcast %125 : vector<1x128xi32> -> vector<1x128xf32>
        %c3_i32_42 = arith.constant 3 : i32
        %127 = vector.broadcast %c3_i32_42 : i32 to vector<1x128xi32>
        %128 = arith.cmpi eq, %99, %127 : vector<1x128xi32>
        %129 = arith.select %128, %105, %103 : vector<1x128xi1>, vector<1x128xf32>
        %130 = arith.xori %101, %78 : vector<1x128xi32>
        %131 = tpu.bitcast %129 : vector<1x128xf32> -> vector<1x128xi32>
        %132 = arith.xori %131, %130 : vector<1x128xi32>
        %133 = tpu.bitcast %132 : vector<1x128xi32> -> vector<1x128xf32>
        %134 = tpu.concatenate %112, %119, %126, %133 in 0 : vector<1x128xf32>, vector<1x128xf32>, vector<1x128xf32>, vector<1x128xf32> -> vector<4x128xf32>
        %135 = arith.index_cast %32 : i32 to index
        %c0_43 = arith.constant 0 : index
        %136 = vector.load %arg7[%135, %c0_43] : memref<16x128xf32, #tpu.memory_space<vmem>>, vector<4x128xf32>
        tpu.vector_store %arg7[%135, %c0_43], %134 {strides = array<i32>} : memref<16x128xf32, #tpu.memory_space<vmem>>, vector<4x128xf32>,
        %137 = arith.addf %50, %112 : vector<1x128xf32>
        %138 = arith.index_cast %37 : i32 to index
        %c0_44 = arith.constant 0 : index
        %139 = vector.load %arg6[%138, %c0_44] : memref<8x128xf32, #tpu.memory_space<vmem>>, vector<1x128xf32>
        tpu.vector_store %arg6[%138, %c0_44], %137 {strides = array<i32>} : memref<8x128xf32, #tpu.memory_space<vmem>>, vector<1x128xf32>,
        %140 = arith.addf %54, %119 : vector<1x128xf32>
        %141 = arith.index_cast %40 : i32 to index
        %c0_45 = arith.constant 0 : index
        %142 = vector.load %arg6[%141, %c0_45] : memref<8x128xf32, #tpu.memory_space<vmem>>, vector<1x128xf32>
        tpu.vector_store %arg6[%141, %c0_45], %140 {strides = array<i32>} : memref<8x128xf32, #tpu.memory_space<vmem>>, vector<1x128xf32>,
        %143 = arith.addf %58, %126 : vector<1x128xf32>
        %144 = arith.index_cast %43 : i32 to index
        %c0_46 = arith.constant 0 : index
        %145 = vector.load %arg6[%144, %c0_46] : memref<8x128xf32, #tpu.memory_space<vmem>>, vector<1x128xf32>
        tpu.vector_store %arg6[%144, %c0_46], %143 {strides = array<i32>} : memref<8x128xf32, #tpu.memory_space<vmem>>, vector<1x128xf32>,
        %146 = arith.addf %62, %133 : vector<1x128xf32>
        %147 = arith.index_cast %46 : i32 to index
        %c0_47 = arith.constant 0 : index
        %148 = vector.load %arg6[%147, %c0_47] : memref<8x128xf32, #tpu.memory_space<vmem>>, vector<1x128xf32>
        tpu.vector_store %arg6[%147, %c0_47], %146 {strides = array<i32>} : memref<8x128xf32, #tpu.memory_space<vmem>>, vector<1x128xf32>,
      }
      %c4_i32_4 = arith.constant 4 : i32
      %c0_5 = arith.constant 0 : index
      %c0_6 = arith.constant 0 : index
      %8 = vector.load %arg6[%c0_5, %c0_6] : memref<8x128xf32, #tpu.memory_space<vmem>>, vector<8x128xf32>
      %cst = arith.constant 0.000000e+00 : f32
      %9 = vector.broadcast %cst : f32 to vector<8x128xf32>
      %10 = arith.subf %9, %8 : vector<8x128xf32>
      %cst_7 = arith.constant 0.000000e+00 : f32
      %11 = vector.broadcast %cst_7 : f32 to vector<8x128xf32>
      %12 = arith.cmpf ogt, %10, %11 : vector<8x128xf32>
      %cst_8 = arith.constant 0.000000e+00 : f32
      %13 = vector.broadcast %cst_8 : f32 to vector<8x128xf32>
      %14 = arith.cmpf olt, %10, %13 : vector<8x128xf32>
      %cst_9 = arith.constant 0.000000e+00 : f32
      %15 = vector.broadcast %cst_9 : f32 to vector<8x128xf32>
      %16 = arith.select %14, %15, %10 : vector<8x128xi1>, vector<8x128xf32>
      %cst_10 = arith.constant 1.000000e+00 : f32
      %17 = vector.broadcast %cst_10 : f32 to vector<8x128xf32>
      %18 = arith.select %12, %17, %16 : vector<8x128xi1>, vector<8x128xf32>
      %c0_11 = arith.constant 0 : index
      %c0_12 = arith.constant 0 : index
      %19 = vector.load %arg5[%c0_11, %c0_12] : memref<8x128xf32, #tpu.memory_space<vmem>>, vector<8x128xf32>
      tpu.vector_store %arg5[%c0_11, %c0_12], %18 {strides = array<i32>} : memref<8x128xf32, #tpu.memory_space<vmem>>, vector<8x128xf32>,
      %cst_13 = arith.constant 0.000000e+00 : f32
      %20 = vector.broadcast %cst_13 : f32 to vector<1x128xf32>
      %c0_i32_14 = arith.constant 0 : i32
      %c4_i32_15 = arith.constant 4 : i32
      %21 = arith.addi %c0_i32_14, %c4_i32_15 : i32
      %c1_i32_16 = arith.constant 1 : i32
      %22 = scf.for %arg9 = %c0_i32_14 to %21 step %c1_i32_16 iter_args(%arg10 = %20) -> (vector<1x128xf32>)  : i32 {
        %c4_i32_21 = arith.constant 4 : i32
        %30 = arith.muli %arg9, %c4_i32_21 : i32
        %cst_22 = arith.constant 0.000000e+00 : f32
        %31 = vector.broadcast %cst_22 : f32 to vector<1x128xf32>
        %c0_i32_23 = arith.constant 0 : i32
        %32 = arith.addi %30, %c0_i32_23 : i32
        %33 = arith.index_cast %32 : i32 to index
        %34 = memref.load %arg3[%33] : memref<16xi32, #tpu.memory_space<smem>>
        %35 = arith.index_cast %34 : i32 to index
        %c0_24 = arith.constant 0 : index
        %36 = vector.load %arg6[%35, %c0_24] : memref<8x128xf32, #tpu.memory_space<vmem>>, vector<1x128xf32>
        %cst_25 = arith.constant 0.000000e+00 : f32
        %37 = vector.broadcast %cst_25 : f32 to vector<1x128xf32>
        %38 = arith.cmpf olt, %36, %37 : vector<1x128xf32>
        %cst_26 = arith.constant 1.000000e+00 : f32
        %cst_27 = arith.constant 0.000000e+00 : f32
        %39 = vector.broadcast %cst_26 : f32 to vector<1x128xf32>
        %40 = vector.broadcast %cst_27 : f32 to vector<1x128xf32>
        %41 = arith.select %38, %39, %40 : vector<1x128xi1>, vector<1x128xf32>
        %42 = arith.addf %31, %41 : vector<1x128xf32>
        %c1_i32_28 = arith.constant 1 : i32
        %43 = arith.addi %30, %c1_i32_28 : i32
        %44 = arith.index_cast %43 : i32 to index
        %45 = memref.load %arg3[%44] : memref<16xi32, #tpu.memory_space<smem>>
        %46 = arith.index_cast %45 : i32 to index
        %c0_29 = arith.constant 0 : index
        %47 = vector.load %arg6[%46, %c0_29] : memref<8x128xf32, #tpu.memory_space<vmem>>, vector<1x128xf32>
        %cst_30 = arith.constant 0.000000e+00 : f32
        %48 = vector.broadcast %cst_30 : f32 to vector<1x128xf32>
        %49 = arith.cmpf olt, %47, %48 : vector<1x128xf32>
        %cst_31 = arith.constant 1.000000e+00 : f32
        %cst_32 = arith.constant 0.000000e+00 : f32
        %50 = vector.broadcast %cst_31 : f32 to vector<1x128xf32>
        %51 = vector.broadcast %cst_32 : f32 to vector<1x128xf32>
        %52 = arith.select %49, %50, %51 : vector<1x128xi1>, vector<1x128xf32>
        %53 = arith.addf %42, %52 : vector<1x128xf32>
        %c2_i32 = arith.constant 2 : i32
        %54 = arith.addi %30, %c2_i32 : i32
        %55 = arith.index_cast %54 : i32 to index
        %56 = memref.load %arg3[%55] : memref<16xi32, #tpu.memory_space<smem>>
        %57 = arith.index_cast %56 : i32 to index
        %c0_33 = arith.constant 0 : index
        %58 = vector.load %arg6[%57, %c0_33] : memref<8x128xf32, #tpu.memory_space<vmem>>, vector<1x128xf32>
        %cst_34 = arith.constant 0.000000e+00 : f32
        %59 = vector.broadcast %cst_34 : f32 to vector<1x128xf32>
        %60 = arith.cmpf olt, %58, %59 : vector<1x128xf32>
        %cst_35 = arith.constant 1.000000e+00 : f32
        %cst_36 = arith.constant 0.000000e+00 : f32
        %61 = vector.broadcast %cst_35 : f32 to vector<1x128xf32>
        %62 = vector.broadcast %cst_36 : f32 to vector<1x128xf32>
        %63 = arith.select %60, %61, %62 : vector<1x128xi1>, vector<1x128xf32>
        %64 = arith.addf %53, %63 : vector<1x128xf32>
        %c3_i32 = arith.constant 3 : i32
        %65 = arith.addi %30, %c3_i32 : i32
        %66 = arith.index_cast %65 : i32 to index
        %67 = memref.load %arg3[%66] : memref<16xi32, #tpu.memory_space<smem>>
        %68 = arith.index_cast %67 : i32 to index
        %c0_37 = arith.constant 0 : index
        %69 = vector.load %arg6[%68, %c0_37] : memref<8x128xf32, #tpu.memory_space<vmem>>, vector<1x128xf32>
        %cst_38 = arith.constant 0.000000e+00 : f32
        %70 = vector.broadcast %cst_38 : f32 to vector<1x128xf32>
        %71 = arith.cmpf olt, %69, %70 : vector<1x128xf32>
        %cst_39 = arith.constant 1.000000e+00 : f32
        %cst_40 = arith.constant 0.000000e+00 : f32
        %72 = vector.broadcast %cst_39 : f32 to vector<1x128xf32>
        %73 = vector.broadcast %cst_40 : f32 to vector<1x128xf32>
        %74 = arith.select %71, %72, %73 : vector<1x128xi1>, vector<1x128xf32>
        %75 = arith.addf %64, %74 : vector<1x128xf32>
        %cst_41 = arith.constant 5.000000e-01 : f32
        %76 = vector.broadcast %cst_41 : f32 to vector<1x128xf32>
        %77 = arith.mulf %75, %76 : vector<1x128xf32>
        %78 = math.floor %77 : vector<1x128xf32>
        %cst_42 = arith.constant 2.000000e+00 : f32
        %79 = vector.broadcast %cst_42 : f32 to vector<1x128xf32>
        %80 = arith.mulf %79, %78 : vector<1x128xf32>
        %81 = arith.subf %75, %80 : vector<1x128xf32>
        %82 = arith.addf %arg10, %81 : vector<1x128xf32>
        scf.yield %82 : vector<1x128xf32>
      }
      %c4_i32_17 = arith.constant 4 : i32
      %23 = vector.shape_cast %22 : vector<1x128xf32> to vector<1x1x128xf32>
      %cst_18 = arith.constant dense<0.000000e+00> : vector<1xf32>
      %24 = vector.multi_reduction <add>, %23, %cst_18 [1, 2] : vector<1x1x128xf32> to vector<1xf32>
      %25 = vector.shape_cast %24 : vector<1xf32> to vector<1x1x1xf32>
      %26 = vector.extract %25[0, 0, 0] : f32 from vector<1x1x1xf32>
      %cst_19 = arith.constant 0.000000e+00 : f32
      %27 = arith.cmpf oeq, %26, %cst_19 : f32
      %28 = arith.extui %27 : i1 to i32
      %c0_20 = arith.constant 0 : index
      %29 = memref.load %arg8[%c0_20] : memref<1xi32, #tpu.memory_space<smem>>
      memref.store %28, %arg8[%c0_20] : memref<1xi32, #tpu.memory_space<smem>>
    } else {
    }
    return
  }
  func.func @transform_0(%arg0: i32, %arg1: i32, %arg2: memref<4xi32, #tpu.memory_space<smem>>, %arg3: memref<16xi32, #tpu.memory_space<smem>>) -> (i32, i32) {
    %c0_i32 = arith.constant 0 : i32
    %c0_i32_0 = arith.constant 0 : i32
    return %c0_i32, %arg0 : i32, i32
  }
  func.func @transform_1(%arg0: i32, %arg1: i32, %arg2: memref<4xi32, #tpu.memory_space<smem>>, %arg3: memref<16xi32, #tpu.memory_space<smem>>) -> (i32, i32) {
    %c0_i32 = arith.constant 0 : i32
    %c0_i32_0 = arith.constant 0 : i32
    return %c0_i32, %arg0 : i32, i32
  }
}

</mosaic_0001>

<bundles_post_ra>
// kernel: tpu_custom_call.1
= control target key start
LH: loop header
LB: loop body
LE: loop exit
PB: predicated region body
PF: predicated region fallthrough
CT: control target
= control target key end

     0   :  { %s617_s12 = smov [#allocation6]   ;;  %s781_s0 = inlined_call_operand.hbm [shape: s32[4], index: 0, kind: input, shape index: {}]   ;;  %s782_s2 = inlined_call_operand.hbm [shape: f32[8,128], index: 2, kind: input, shape index: {}]   ;;  %s783_s3 = inlined_call_operand.hbm [shape: f32[8,128], index: 3, kind: output, shape index: {}]   ;;  %s784_s1 = inlined_call_operand.vmem [shape: s32[16], index: 1, kind: input, shape index: {}]  }
   0x1   :  { %9 = dma.hbm_to_smem %s781_s0, 16, %s617_s12, [#allocation5] }
   0x2   :  { %s10_s17 = sshll.u32 %s784_s1, 4  ;;  %s11_s17 = int_to_ptr.vmem [resolvable:$true] %s10_s17 }
   0x3   :  { %s497_s18 = scalar_lea.vmem %s11_s17, 16  ;;  %p502_p1 = scmp.lt.s32.totalorder %s11_s17, %s11_s17 }
   0x4   :  { %p498_p0 = scmp.ne.s32.totalorder %s11_s17, %s497_s18  ;;  %p503_p2 = scmp.lt.s32.totalorder %s497_s18, %s497_s18 }
   0x6   :  { %p504_p3 = por %p503_p2, %p502_p1 }
   0x8   :  { %p505_p4 = pnand %p504_p3, %p498_p0 }
   0xa   :  { %508 = shalt.err (!%p505_p4)  }
   0xb   :  { %s618_s19 = smov [#allocation7]  }
   0xc   :  { %13 = dma.vmem_to_smem %s11_s17, 16, %s618_s19, [#allocation5] }
   0xd   :  { %583 = dma.done.wait [#allocation5], 32 }
   0xe   :  { %584 = vsyncadd [#allocation5], 4294967264 }
   0xf   :  { %15 = sfence }
  0x10   :  { %16 = vsyncpa [#allocation9], 0 }
  0x11   :  { %17 = vsyncpa [#allocation10], 0  ;;  %s651_s0 = smov 0   ;;  %s653_s20 = smov 0  }
  0x12   :  { %s655_s1 = smov 0  }
  0x13 LB: > { %s402_s21 = sadd.s32 4294967295, %s603_s1   ;;  %s32_s22 = sadd.s32 1, %s599_s20  ;;  %s603_s1 = sphi %s655_s1, %s23_s1   ;;  %s599_s20 = sphi %s653_s20, %s789_s20   ;;  %s595_s0 = sphi %s651_s0, %s788_s0  }
  0x14   : > { %p33_p5 = scmp.ge.s32.totalorder %s32_s22, 3  ;;  %p403_p6 = scmp.ge.s32.totalorder %s603_s1, 1 }
  0x15   : > { %p92_p7 = scmp.lt.s32.totalorder %s603_s1, 4  ;;  %p678_p9 = scmp.eq.s32.totalorder %s402_s21, 0 }
  0x16   : > { %s791_s22 = smov (%p33_p5, %s32_s22), 0  ;;  %s619_s25 = smov [#allocation8]  }
  0x17   : > { %p672_p8 = pnand %p403_p6, %p92_p7  ;;  %s107_s26 = sshll.u32 %s619_s25, 4  ;;  %s108_s26 = int_to_ptr.vmem [resolvable:$true] %s107_s26 }
  0x18   : > { %s520_s27 = scalar_lea.vmem %s108_s26, 128  ;;  %p528_p2 = scmp.lt.s32.totalorder %s108_s26, %s108_s26 }
  0x19   : > { %p425_p10 = pneg %p672_p8  ;;  %p521_p13 = scmp.ne.s32.totalorder %s108_s26, %s520_s27 }
  0x1a   : > { %p529_p3 = scmp.lt.s32.totalorder %s520_s27, %s520_s27 }
  0x1b   : > { %p426_p11 = pnand %p678_p9, %p425_p10 }
  0x1c   : > { %p530_p4 = por %p529_p3, %p528_p2 }
  0x1d   : > { %p511_p12 = pneg %p426_p11 }
  0x1f   : > { %p523_p0 = pnand %p521_p13, %p511_p12 }
  0x21   : > { %p524_p1 = pneg %p523_p0 }
  0x23   : > { %p531_p5 = pnand %p530_p4, %p524_p1 }
  0x25   : > { %534 = shalt.err (!%p531_p5)
}
  0x26   : > { %428 = dma.hbm_to_vmem [thread:$0]  (!%p426_p11), %s782_s2, 128, %s108_s26, [#allocation9]  }
  0x27   : > { %120 = sbr.rel (%p672_p8) target bundleno = 370 (0x172), region = 24 }
  0x2c   : > { %586 = dma.done.wait (%p678_p9), [#allocation9], 128  }
  0x2d   : > { %588 = vsyncadd (%p678_p9), [#allocation9], 4294967168  ;;  %p407_p6 = scmp.ne.s32.totalorder %s595_s0, 0 }
  0x2e   : > { %s621_s30 = smov (!%p407_p6), 0  }
  0x2f   : > { %133 = sbr.rel (%p407_p6) target bundleno = 55 (0x37), region = 32  ;;  %139 = sst [smem:[#allocation4]] (!%p407_p6), %s621_s30 }
  0x34   : > { %v134_v0 = vld [vmem:[#allocation8] sm:$0xff]  ;;  %v620_v1 = vmov 0.0  }
  0x35   : > { %135 = vst [vmem:[#allocation2] sm:$0xff] %v134_v0  ;;  %136 = vst [vmem:[#allocation3] sm:$0xff] %v620_v1 }
  0x36   : > { %137 = vst [vmem:[#allocation3 + $0x8] sm:$0xff] %v620_v1 }
  0x37 PF: > { %s140_s4 = sld [smem:[#allocation4]] }
  0x3d   : > { %p408_p7 = scmp.ne.s32.totalorder %s140_s4, 0 }
  0x3e   : > { %s696_s5 = smov (!%p408_p7), 0  }
  0x3f   : > { %144 = sbr.rel (%p408_p7) target bundleno = 355 (0x163), region = 36 }
  0x44 LB: >> { %s151_s6 = sld [smem:[#allocation6 + %s607_s5]]  ;;  %v622_v22 = vmov 0   ;;  %vm241_vm7 = vcmask 1040384   ;;  %vm243_vm8 = vcmask 1041408   ;;  %vm245_vm9 = vcmask 1042432   ;;  %s150_s5 = sadd.s32 1, %s607_s5   ;;  %s607_s5 = sphi %s696_s5, %s150_s5  }
  0x45   : >> { %p147_p8 = scmp.ge.s32.totalorder %s150_s5, 4  }
  0x46   : > { %v609_v0 = vmov (%p147_p8), 0.0   ;;  %s745_s0 = smov (%p147_p8), 0  }
  0x4a   : >> { %s702_s7 = sshll.u32 %s151_s6, 2 }
  0x4b   : >> { %s705_s8 = sld [smem:[#allocation7 + %s702_s7]]  ;;  %s156_s9 = sadd.s32 1, %s702_s7 }
  0x4c   : >> { %s158_s10 = sadd.s32 2, %s702_s7  ;;  %s709_s11 = sld [smem:[#allocation7 + %s156_s9]] }
  0x4d   : >> { %s160_s12 = sadd.s32 3, %s702_s7  ;;  %s153_s13 = scalar_lea.vmem [#allocation3], %s702_s7 }
  0x4e   : >> { %v154_v2 = vld [vmem:[%s153_s13] sm:$0xf]  ;;  %s715_s14 = sld [smem:[#allocation7 + %s158_s10]] }
  0x4f   : >> { %s717_s15 = sld [smem:[#allocation7 + %s160_s12]]  ;;  %v168_v3 = vrot.slane %v154_v2, 1  ;;  %v173_v5 = vrot.slane %v154_v2, 2  ;;  %v178_v7 = vrot.slane %v154_v2, 3 }
  0x51   : >> { %s162_s16 = scalar_lea.vmem [#allocation2], %s705_s8 }
  0x52   : >> { %v163_v4 = vld [vmem:[%s162_s16] sm:$0x1]  ;;  %s165_s17 = scalar_lea.vmem [#allocation2], %s709_s11 }
  0x53   : >> { %v164_v6 = vsub.f32 %v163_v4, %v154_v2  ;;  %v166_v8 = vld [vmem:[%s165_s17] sm:$0x1] }
  0x54   : >> { %v170_v9 = vsub.f32 %v166_v8, %v168_v3  ;;  %s171_s18 = scalar_lea.vmem [#allocation2], %s715_s14 }
  0x55   : >> { %v172_v10 = vld [vmem:[%s171_s18] sm:$0x1]  ;;  %s176_s19 = scalar_lea.vmem [#allocation2], %s717_s15  ;;  %v181_v13 = vand.u32 2147483647, %v164_v6  ;;  %v186_v14 = vand.u32 2147483648, %v164_v6 }
  0x56   : >> { %v175_v11 = vsub.f32 %v172_v10, %v173_v5  ;;  %v177_v12 = vld [vmem:[%s176_s19] sm:$0x1]  ;;  %v182_v16 = vand.u32 2147483647, %v170_v9  ;;  %v188_v17 = vand.u32 2147483648, %v170_v9 }
  0x57   : >> { %v180_v15 = vsub.f32 %v177_v12, %v178_v7 }
  0x58   : >> { %v183_v18 = vand.u32 2147483647, %v175_v11  ;;  %v190_v19 = vand.u32 2147483648, %v175_v11  ;;  %vm194_vm0 = vcmp.lt.f32.partialorder %v182_v16, %v181_v13  ;;  %v193_v21 = vmax.f32 %v181_v13, %v182_v16 }
  0x59   : >> { %v184_v20 = vand.u32 2147483647, %v180_v15  ;;  %v195_v23 = vsel %vm194_vm0, 1, %v622_v22  ;;  %v196_v24 = vmin.f32 %v181_v13, %v182_v16  ;;  %v197_v25 = vxor.u32 %v188_v17, %v186_v14 }
  0x5a   : >> { %v192_v26 = vand.u32 2147483648, %v180_v15 }
  0x5b   : >> { %v198_v27 = vmax.f32 %v196_v24, %v183_v18  ;;  %vm200_vm1 = vcmp.lt.f32.partialorder %v183_v18, %v196_v24  ;;  %v202_v28 = vmin.f32 %v196_v24, %v183_v18  ;;  %v203_v29 = vxor.u32 %v197_v25, %v190_v19 }
  0x5c   : >> { %v201_v30 = vsel %vm200_vm1, 2, %v195_v23 }
  0x5d   : >> { %v199_v31 = vmin.f32 %v193_v21, %v198_v27  ;;  %v204_v32 = vmax.f32 %v202_v28, %v184_v20  ;;  %vm206_vm2 = vcmp.lt.f32.partialorder %v184_v20, %v202_v28  ;;  %v208_v33 = vmin.f32 %v202_v28, %v184_v20 }
  0x5e   : >> { %v207_v34 = vsel %vm206_vm2, 3, %v201_v30  ;;  %v209_v35 = vxor.u32 %v203_v29, %v192_v26 }
  0x5f   : >> { %v205_v36 = vmin.f32 %v199_v31, %v204_v32  ;;  %v210_v37 = vmin.f32 %v208_v33, 20.0  ;;  %vm212_vm3 = vcmp.eq.s32.totalorder %v207_v34, 0  ;;  %vm218_vm4 = vcmp.eq.s32.totalorder %v207_v34, 1 }
  0x60   : >> { %v214_v38 = vxor.u32 %v209_v35, %v186_v14  ;;  %v220_v39 = vxor.u32 %v209_v35, %v188_v17  ;;  %vm224_vm5 = vcmp.eq.s32.totalorder %v207_v34, 2  ;;  %v226_v40 = vxor.u32 %v209_v35, %v190_v19 }
  0x61   : >> { %v211_v41 = vmin.f32 %v205_v36, 20.0  ;;  %vm230_vm6 = vcmp.eq.s32.totalorder %v207_v34, 3 }
  0x63   : >> { %v213_v42 = vsel %vm212_vm3, %v211_v41, %v210_v37  ;;  %v219_v43 = vsel %vm218_vm4, %v211_v41, %v210_v37  ;;  %v225_v44 = vsel %vm224_vm5, %v211_v41, %v210_v37  ;;  %v231_v45 = vsel %vm230_vm6, %v211_v41, %v210_v37 }
  0x64   : >> { %v216_v46 = vxor.u32 %v214_v38, %v213_v42  ;;  %v222_v47 = vxor.u32 %v220_v39, %v219_v43  ;;  %v228_v48 = vxor.u32 %v226_v40, %v225_v44  ;;  %v233_v49 = vxor.u32 %v231_v45, %v203_v29 }
  0x66   : >> { %v248_v50 = vadd.f32 %v216_v46, %v164_v6  ;;  %v250_v51 = vadd.f32 %v222_v47, %v170_v9  ;;  %v252_v52 = vadd.f32 %v228_v48, %v175_v11  ;;  %v235_v53 = vrot.slane %v222_v47, 7 }
  0x67   : >> { %v237_v54 = vrot.slane %v228_v48, 6  ;;  %v239_v55 = vrot.slane %v233_v49, 5  ;;  %v254_v56 = vadd.f32 %v233_v49, %v180_v15  ;;  %149 = sbr.rel (!%p147_p8) target bundleno = 68 (0x44), region = 88 }
  0x68   : >> { %249 = vst [vmem:[%s162_s16] sm:$0x1] %v248_v50  ;;  %v242_v57 = vsel %vm241_vm7, %v216_v46, %v235_v53 }
  0x69   : >> { %251 = vst [vmem:[%s165_s17] sm:$0x1] %v250_v51  ;;  %v244_v58 = vsel %vm243_vm8, %v242_v57, %v237_v54 }
  0x6a   : >> { %253 = vst [vmem:[%s171_s18] sm:$0x1] %v252_v52  ;;  %v246_v59 = vsel %vm245_vm9, %v244_v58, %v239_v55 }
  0x6b   : >> { %247 = vst [vmem:[%s153_s13] sm:$0xf] %v246_v59  ;;  %255 = vst [vmem:[%s176_s19] sm:$0x1] %v254_v56 }
  0x72   : > { %v256_v60 = vld [vmem:[#allocation2] sm:$0xff] }
  0x73   : > { %v257_v61 = vsub.f32 0.0, %v256_v60 }
  0x75   : > { %vm258_vm10 = vcmp.gt.f32.partialorder %v257_v61, 0.0  ;;  %vm259_vm11 = vcmp.lt.f32.partialorder %v257_v61, 0.0 }
  0x76   : > { %v260_v62 = vsel %vm259_vm11, 0.0, %v257_v61 }
  0x77   : > { %v261_v63 = vsel %vm258_vm10, 1.0, %v260_v62 }
  0x78   : > { %262 = vst [vmem:[#allocation11] sm:$0xff] %v261_v63 }
  0x79 LB: >> { %s410_s23 = sshll.u32 %s615_s0, 2  ;;  %v623_v3 = vmov 0.0   ;;  %s268_s0 = sadd.s32 1, %s615_s0   ;;  %s615_s0 = sphi %s745_s0, %s268_s0   ;;  %v611_v0 = vphi %v609_v0, %v610_v0  }
  0x7a   : >> { %s271_s24 = sld [smem:[#allocation7 + %s410_s23]]  ;;  %s277_s25 = sadd.s32 1, %s410_s23 }
  0x7b   : >> { %s278_s26 = sld [smem:[#allocation7 + %s277_s25]]  ;;  %s284_s27 = sadd.s32 2, %s410_s23 }
  0x7c   : >> { %s285_s28 = sld [smem:[#allocation7 + %s284_s27]]  ;;  %s291_s29 = sadd.s32 3, %s410_s23 }
  0x7d   : >> { %s292_s30 = sld [smem:[#allocation7 + %s291_s29]]  ;;  %p265_p9 = scmp.ge.s32.totalorder %s268_s0, 4  }
  0x80   : >> { %s272_s4 = scalar_lea.vmem [#allocation2], %s271_s24 }
  0x81   : >> { %v273_v1 = vld [vmem:[%s272_s4] sm:$0x1]  ;;  %s279_s5 = scalar_lea.vmem [#allocation2], %s278_s26 }
  0x82   : >> { %vm274_vm12 = vcmp.lt.f32.partialorder %v273_v1, 0.0  ;;  %v280_v2 = vld [vmem:[%s279_s5] sm:$0x1]  ;;  %s286_s6 = scalar_lea.vmem [#allocation2], %s285_s28 }
  0x83   : >> { %v275_v4 = vsel %vm274_vm12, 1.0, %v623_v3  ;;  %vm281_vm13 = vcmp.lt.f32.partialorder %v280_v2, 0.0  ;;  %v287_v5 = vld [vmem:[%s286_s6] sm:$0x1]  ;;  %s293_s7 = scalar_lea.vmem [#allocation2], %s292_s30 }
  0x84   : >> { %v282_v6 = vsel %vm281_vm13, 1.0, %v623_v3  ;;  %vm288_vm14 = vcmp.lt.f32.partialorder %v287_v5, 0.0  ;;  %v294_v7 = vld [vmem:[%s293_s7] sm:$0x1] }
  0x85   : >> { %v283_v8 = vadd.f32 %v282_v6, %v275_v4  ;;  %v289_v9 = vsel %vm288_vm14, 1.0, %v623_v3  ;;  %vm295_vm15 = vcmp.lt.f32.partialorder %v294_v7, 0.0 }
  0x86   : >> { %v296_v10 = vsel %vm295_vm15, 1.0, %v623_v3 }
  0x87   : >> { %v290_v11 = vadd.f32 %v289_v9, %v283_v8 }
  0x89   : >> { %v297_v12 = vadd.f32 %v296_v10, %v290_v11 }
  0x8b   : >> { %v298_v13 = vmul.f32 0.5, %v297_v12 }
  0x8d   : >> { %v299_v14 = vfloor.f32 %v298_v13 }
  0x8f   : >> { %v300_v15 = vmul.f32 2.0, %v299_v14 }
  0x91   : >> { %v301_v16 = vsub.f32 %v297_v12, %v300_v15  ;;  %267 = sbr.rel (!%p265_p9) target bundleno = 121 (0x79), region = 99 }
  0x93   : >> { %v302_v17 = vadd.f32 %v611_v0, %v301_v16  }
  0x95   : >> { %v610_v0 = vmov %v302_v17   ;;  %v304_v18 = vsel (%p265_p9), %vm241_vm7, %v302_v17, 0.0 }
  0x96   : > { %305 = vadd.xlane.f32.xlu0 %v304_v18 }
 0x11f   : > { %v306_v19 = vpop.xlane.xlu0 %305 }
 0x120   : > { %v307_v20 = vrot.slane %v306_v19, 4 }
 0x122   : > { %v308_v21 = vadd.f32 %v307_v20, %v306_v19 }
 0x124   : > { %v309_v22 = vrot.slane %v308_v21, 2 }
 0x126   : > { %v310_v23 = vadd.f32 %v309_v22, %v308_v21 }
 0x128   : > { %v311_v24 = vrot.slane %v310_v23, 1 }
 0x12a   : > { %v312_v25 = vadd.f32 %v311_v24, %v310_v23 }
 0x12c   : > { %415 = vpush %v312_v25 }
 0x15d   : > { %s416_s8 = spop %415 }
 0x15e   : > { %p314_p10 = scmp.eq.f32.partialorder %s416_s8, 0.0 }
 0x160   : > { %s315_s9 = scalar_select %p314_p10, 1, 0 }
 0x162   : > { %317 = sst [smem:[#allocation4]] %s315_s9 }
 0x163 PF: > { %p757_p11 = scmp.eq.s32.totalorder %s402_s21, 2  ;;  %s624_s11 = smov [#allocation11]  }
 0x164   : > { %s327_s12 = sshll.u32 %s624_s11, 4  ;;  %s328_s12 = int_to_ptr.vmem [resolvable:$true] %s327_s12 }
 0x165   : > { %s535_s13 = scalar_lea.vmem %s328_s12, 128  ;;  %p542_p1 = scmp.lt.s32.totalorder %s328_s12, %s328_s12 }
 0x166   : > { %p536_p12 = scmp.ne.s32.totalorder %s328_s12, %s535_s13  ;;  %p543_p2 = scmp.lt.s32.totalorder %s535_s13, %s535_s13 }
 0x168   : > { %p537_p13 = pnand %p536_p12, %p757_p11  ;;  %p544_p3 = por %p543_p2, %p542_p1 }
 0x16a   : > { %p538_p0 = pneg %p537_p13 }
 0x16c   : > { %p545_p4 = pnand %p544_p3, %p538_p0 }
 0x16e   : > { %548 = shalt.err (!%p545_p4)
}
 0x16f   : > { %422 = dma.vmem_to_hbm [thread:$0]  (%p757_p11), %s328_s12, 128, %s783_s3, [#allocation10]  }
 0x170   : > { %590 = dma.done.wait (%p757_p11), [#allocation10], 128  }
 0x171   : > { %592 = vsyncadd (%p757_p11), [#allocation10], 4294967168 }
 0x172 PF: > { %s23_s1 = sadd.s32 1, %s603_s1   ;;  %s788_s0 = smov %s599_s20 }
 0x173   : > { %p20_p5 = scmp.ge.s32.totalorder %s23_s1, 5   ;;  %s789_s20 = smov %s791_s22 }
 0x175   :  { %22 = sbr.rel (!%p20_p5) target bundleno = 19 (0x13), region = 110 }
 0x17a   :  { %340 = vsyncpa [#allocation9], 1 }
 0x17b   :  { %342 = vsyncpa [#allocation9 + $0x1], 1 }
 0x17c   :  { %343 = vsyncpa [#allocation10], 1 }
 0x17d   :  { %345 = vsyncpa [#allocation10 + $0x1], 1 }

</bundles_post_ra>
